<compile_context>
chip_gen: v6e
topology: v6e:2x2x1
jax: 0.10.0
libtpu: 0.0.40
codegen_flags: <defaults>
</compile_context>

<pallas_src>
import functools

import jax
import jax.numpy as jnp
from jax.experimental import pallas as pl
from jax.experimental.pallas import tpu as pltpu

K = 3     # kernel_size
PAD = 1   # padding
# stride = 1 (baked into the im2col construction below)


def conv_prelu_kernel(p_ref, w_ref, b_ref, a_ref, o_ref):
    """One block of output pixels per grid step.

    p_ref: (K*K*Cin, M_blk)  im2col'd input patches (pixels on the lane axis)
    w_ref: (Cout, K*K*Cin)   conv weights
    b_ref: (Cout, 1)         conv bias
    a_ref: (1, 1)            PReLU slope (single shared parameter), in SMEM
    o_ref: (Cout, M_blk)     output block (lane-dense, unmasked stores)
    """
    # Whole conv for this pixel block as a single MXU matmul with f32 accumulation.
    acc = jnp.dot(w_ref[...], p_ref[...], preferred_element_type=jnp.float32)
    acc = acc + b_ref[...]                      # (Cout, 1) broadcast over lanes
    alpha = a_ref[0, 0]                         # scalar read from SMEM
    # PReLU: f(x) = x if x >= 0 else alpha * x  (single shared alpha)
    o_ref[...] = jnp.where(acc >= 0, acc, alpha * acc).astype(o_ref.dtype)


@functools.partial(jax.jit, static_argnames=("m_block_cap",))
def conv_block_forward(x_nchw, weight_oihw, bias, alpha, *, m_block_cap=2048):
    """ConvBlock.forward with norm=None, activation='prelu'.

    x_nchw:      (N, Cin, H, W)     float32
    weight_oihw: (Cout, Cin, K, K)  float32 (PyTorch Conv2d layout)
    bias:        (Cout,)            float32
    alpha:       scalar             float32 (PReLU weight)
    returns:     (N, Cout, H, W)    float32
    """
    N, Cin, H, W = x_nchw.shape
    Cout = weight_oihw.shape[0]
    M = N * H * W
    KKC = K * K * Cin

    # ---- wrapper-side layout plumbing (plain JAX / XLA) ----
    x_nhwc = jnp.transpose(x_nchw, (0, 2, 3, 1))                       # (N,H,W,Cin)
    x_pad = jnp.pad(x_nhwc, ((0, 0), (PAD, PAD), (PAD, PAD), (0, 0)))  # zero pad
    # im2col: tap-major, channel-minor along the contraction axis; pixels last.
    taps = [x_pad[:, kh:kh + H, kw:kw + W, :] for kh in range(K) for kw in range(K)]
    patches = jnp.stack(taps, axis=0)                       # (K*K, N, H, W, Cin)
    patches_t = jnp.transpose(patches, (0, 4, 1, 2, 3))     # (K*K, Cin, N, H, W)
    p_t = patches_t.reshape(KKC, M)                         # (36, M), lane-dense

    # weight[c, ci, kh, kw] -> wT[c, (kh*K + kw)*Cin + ci]  (matches p_t order)
    w_t = jnp.transpose(weight_oihw, (0, 2, 3, 1)).reshape(Cout, KKC)
    b = bias.reshape(Cout, 1).astype(jnp.float32)
    a = jnp.asarray(alpha, jnp.float32).reshape(1, 1)

    # Pixel-axis block: whole problem in one grid step when it is small,
    # otherwise multiple-of-128 strips (keeps VMEM bounded; no halo needed
    # because im2col already absorbed it).
    m_blk = M if M <= m_block_cap else m_block_cap
    grid = (pl.cdiv(M, m_blk),)

    out_t = pl.pallas_call(
        conv_prelu_kernel,
        out_shape=jax.ShapeDtypeStruct((Cout, M), jnp.float32),
        grid_spec=pltpu.PrefetchScalarGridSpec(
            num_scalar_prefetch=0,
            grid=grid,
            in_specs=[
                pl.BlockSpec((KKC, m_blk), lambda i: (0, i)),
                pl.BlockSpec((Cout, KKC), lambda i: (0, 0)),
                pl.BlockSpec((Cout, 1), lambda i: (0, 0)),
                pl.BlockSpec(memory_space=pltpu.MemorySpace.SMEM),
            ],
            out_specs=pl.BlockSpec((Cout, m_blk), lambda i: (0, i)),
        ),
        compiler_params=pltpu.CompilerParams(
            dimension_semantics=("parallel",)),
    )(p_t, w_t, b, a)

    # (Cout, N*H*W) -> (N, Cout, H, W): free layout plumbing in the wrapper.
    return jnp.transpose(out_t.reshape(Cout, N, H, W), (1, 0, 2, 3))


if __name__ == "__main__":
    # Small shapes consistent with the module: ConvBlock(input_size=4, output_size=8)
    N, Cin, H, W = 2, 4, 16, 16
    Cout = 8

    key = jax.random.PRNGKey(0)
    kx, kw, kb = jax.random.split(key, 3)

    x = jax.random.normal(kx, (N, Cin, H, W), dtype=jnp.float32)

    # Deterministic parameter init (Conv2d-like fan-in scaling; synthetic).
    fan_in = Cin * K * K
    bound = 1.0 / (fan_in ** 0.5)
    weight = jax.random.uniform(kw, (Cout, Cin, K, K), jnp.float32, -bound, bound)
    bias = jax.random.uniform(kb, (Cout,), jnp.float32, -bound, bound)
    alpha = jnp.float32(0.25)  # PyTorch PReLU default init

    out = conv_block_forward(x, weight, bias, alpha)
    out = jax.block_until_ready(out)

    # Pure-JAX reference for correctness.
    ref = jax.lax.conv_general_dilated(
        x, weight, window_strides=(1, 1), padding=((PAD, PAD), (PAD, PAD)),
        dimension_numbers=("NCHW", "OIHW", "NCHW"))
    ref = ref + bias.reshape(1, Cout, 1, 1)
    ref = jnp.where(ref >= 0, ref, alpha * ref)

    assert out.shape == (N, Cout, H, W)
    assert jnp.allclose(out, ref, atol=1e-5, rtol=1e-5), "mismatch vs reference"

    print("KERNEL_OK")
</pallas_src>

<mosaic_0001>
module attributes {stable_mosaic.version = 11 : i64} {
  func.func @conv_prelu_kernel(%arg0: i32, %arg1: memref<36x512xf32, #tpu.memory_space<vmem>>, %arg2: memref<8x36xf32, #tpu.memory_space<vmem>>, %arg3: memref<8x1xf32, #tpu.memory_space<vmem>>, %arg4: memref<1x1xf32, #tpu.memory_space<smem>>, %arg5: memref<8x512xf32, #tpu.memory_space<vmem>>) attributes {dimension_semantics = [#tpu.dimension_semantics<parallel>], iteration_bounds = array<i64: 1>, scalar_prefetch = 0 : i64, scratch_operands = 0 : i64, tpu.core_type = #tpu.core_type<tc>, window_params = [{transform_indices = @transform_0, window_bounds = array<i64: 36, 512>}, {pipeline_mode = #tpu.pipeline_mode<synchronous>, transform_indices = @transform_1, window_bounds = array<i64: 8, 36>}, {pipeline_mode = #tpu.pipeline_mode<synchronous>, transform_indices = @transform_2, window_bounds = array<i64: 8, 1>}, {transform_indices = @transform_3, window_bounds = array<i64: 1, 1>}, {transform_indices = @transform_4, window_bounds = array<i64: 8, 512>}]} {
    %c0 = arith.constant 0 : index
    %c0_0 = arith.constant 0 : index
    %0 = vector.load %arg2[%c0, %c0_0] : memref<8x36xf32, #tpu.memory_space<vmem>>, vector<8x36xf32>
    %c0_1 = arith.constant 0 : index
    %c0_2 = arith.constant 0 : index
    %1 = vector.load %arg1[%c0_1, %c0_2] : memref<36x512xf32, #tpu.memory_space<vmem>>, vector<36x512xf32>
    %cst = arith.constant dense<0.000000e+00> : vector<8x512xf32>
    %2 = tpu.matmul %0, %1, %cst {dimension_numbers = #tpu.dot_dimension_numbers<[1], [0], [0], [1], [0, 0, 1, 1], [], []>} : vector<8x36xf32>, vector<36x512xf32>, vector<8x512xf32> -> vector<8x512xf32>
    %c0_3 = arith.constant 0 : index
    %c0_4 = arith.constant 0 : index
    %3 = vector.load %arg3[%c0_3, %c0_4] : memref<8x1xf32, #tpu.memory_space<vmem>>, vector<8x1xf32>
    %4 = vector.broadcast %3 : vector<8x1xf32> to vector<8x512xf32>
    %5 = arith.addf %2, %4 : vector<8x512xf32>
    %c0_5 = arith.constant 0 : index
    %c0_6 = arith.constant 0 : index
    %6 = memref.load %arg4[%c0_5, %c0_6] : memref<1x1xf32, #tpu.memory_space<smem>>
    %cst_7 = arith.constant 0.000000e+00 : f32
    %7 = vector.broadcast %cst_7 : f32 to vector<8x512xf32>
    %8 = arith.cmpf oge, %5, %7 : vector<8x512xf32>
    %9 = vector.broadcast %6 : f32 to vector<8x512xf32>
    %10 = arith.mulf %9, %5 : vector<8x512xf32>
    %11 = arith.select %8, %5, %10 : vector<8x512xi1>, vector<8x512xf32>
    %c0_8 = arith.constant 0 : index
    %c0_9 = arith.constant 0 : index
    %12 = vector.load %arg5[%c0_8, %c0_9] : memref<8x512xf32, #tpu.memory_space<vmem>>, vector<8x512xf32>
    tpu.vector_store %arg5[%c0_8, %c0_9], %11 {strides = array<i32>} : memref<8x512xf32, #tpu.memory_space<vmem>>, vector<8x512xf32>,
    return
  }
  func.func @transform_0(%arg0: i32) -> (i32, i32) {
    %c0_i32 = arith.constant 0 : i32
    %c0_i32_0 = arith.constant 0 : i32
    return %c0_i32, %arg0 : i32, i32
  }
  func.func @transform_1(%arg0: i32) -> (i32, i32) {
    %c0_i32 = arith.constant 0 : i32
    %c0_i32_0 = arith.constant 0 : i32
    %c0_i32_1 = arith.constant 0 : i32
    return %c0_i32, %c0_i32_0 : i32, i32
  }
  func.func @transform_2(%arg0: i32) -> (i32, i32) {
    %c0_i32 = arith.constant 0 : i32
    %c0_i32_0 = arith.constant 0 : i32
    %c0_i32_1 = arith.constant 0 : i32
    return %c0_i32, %c0_i32_0 : i32, i32
  }
  func.func @transform_3(%arg0: i32) -> (i32, i32) {
    %c0_i32 = arith.constant 0 : i32
    %c0_i32_0 = arith.constant 0 : i32
    %c0_i32_1 = arith.constant 0 : i32
    return %c0_i32, %c0_i32_0 : i32, i32
  }
  func.func @transform_4(%arg0: i32) -> (i32, i32) {
    %c0_i32 = arith.constant 0 : i32
    %c0_i32_0 = arith.constant 0 : i32
    return %c0_i32, %arg0 : i32, i32
  }
}

</mosaic_0001>

<bundles_post_ra>
// kernel: conv_block_forward.1
= control target key start
LH: loop header
LB: loop body
LE: loop exit
PB: predicated region body
PF: predicated region fallthrough
CT: control target
= control target key end

     0   :  { %vm49_vm0 = vcmask 1043456   ;;  %v235_v3 = vmov 0.0   ;;  %vm45_vm1 = vcmask 293888   ;;  %v236_v23 = vmov 0   ;;  %s343_s0 = inlined_call_operand.vmem [shape: f32[36,512], index: 0, kind: input, shape index: {}]   ;;  %s344_s1 = inlined_call_operand.vmem [shape: f32[8,36], index: 1, kind: input, shape index: {}]   ;;  %s345_s2 = inlined_call_operand.vmem [shape: f32[8,1], index: 2, kind: input, shape index: {}]   ;;  %s346_s3 = inlined_call_operand.<no memory space> [shape: f32[1,1], index: 3, kind: input, shape index: {}]   ;;  %s347_s4 = inlined_call_operand.vmem [shape: f32[8,512], index: 4, kind: output, shape index: {}]  }
   0x1   :  { %v36_v0 = vld [vmem:[%s343_s0 + $0x88] sm:$0xf]  ;;  %v38_v1 = vld [vmem:[%s343_s0 + $0x98] sm:$0xf]  ;;  %v35_v2 = vld [vmem:[%s343_s0 + $0x80] sm:$0xf]  ;;  %126 = vmatprep.mubr.f32.mxu0 %v235_v3  ;;  %197 = vmatprep.mubr.f32.mxu1 %v235_v3  ;;  %v209_v26 = vstv %s346_s3 }
   0x2   :  { %226 = vmatprep.subr.msk.mxu0 %vm49_vm0, %v36_v0  ;;  %229 = vmatprep.subr.msk.mxu1 %vm49_vm0, %v38_v1  ;;  %v37_v4 = vld [vmem:[%s343_s0 + $0x90] sm:$0xf]  ;;  %v32_v5 = vld [vmem:[%s343_s0 + $0x68] sm:$0xff]  ;;  %v34_v6 = vld [vmem:[%s343_s0 + $0x78] sm:$0xff] }
   0x3   :  { %227 = vmatpush1.msk.msra.mxu0 %vm49_vm0, %v35_v2  ;;  %230 = vmatpush1.msk.msra.mxu1 %vm49_vm0, %v37_v4  ;;  %v31_v7 = vld [vmem:[%s343_s0 + $0x60] sm:$0xff]  ;;  %v33_v8 = vld [vmem:[%s343_s0 + $0x70] sm:$0xff]  ;;  %v28_v9 = vld [vmem:[%s343_s0 + $0x48] sm:$0xff] }
   0x4   :  { %86 = vmatprep.subr.mxu0 %v32_v5  ;;  %157 = vmatprep.subr.mxu1 %v34_v6  ;;  %v30_v10 = vld [vmem:[%s343_s0 + $0x58] sm:$0xff]  ;;  %v27_v11 = vld [vmem:[%s343_s0 + $0x40] sm:$0xff]  ;;  %v29_v12 = vld [vmem:[%s343_s0 + $0x50] sm:$0xff] }
   0x5   :  { %87 = vmatpush1.msra.mxu0 %v31_v7  ;;  %158 = vmatpush1.msra.mxu1 %v33_v8  ;;  %v24_v13 = vld [vmem:[%s343_s0 + $0x28] sm:$0xff]  ;;  %v26_v14 = vld [vmem:[%s343_s0 + $0x38] sm:$0xff]  ;;  %v23_v15 = vld [vmem:[%s343_s0 + $0x20] sm:$0xff] }
   0x6   :  { %88 = vmatprep.subr.mxu0 %v28_v9  ;;  %159 = vmatprep.subr.mxu1 %v30_v10  ;;  %v25_v16 = vld [vmem:[%s343_s0 + $0x30] sm:$0xff]  ;;  %v20_v17 = vld [vmem:[%s343_s0 + $0x8] sm:$0xff]  ;;  %v22_v18 = vld [vmem:[%s343_s0 + $0x18] sm:$0xff] }
   0x7   :  { %89 = vmatpush1.msra.mxu0 %v27_v11  ;;  %160 = vmatpush1.msra.mxu1 %v29_v12  ;;  %v19_v19 = vld [vmem:[%s343_s0] sm:$0xff]  ;;  %v21_v20 = vld [vmem:[%s343_s0 + $0x10] sm:$0xff] }
   0x8   :  { %90 = vmatprep.subr.mxu0 %v24_v13  ;;  %161 = vmatprep.subr.mxu1 %v26_v14  ;;  %v18_v21 = vld [vmem:[%s344_s1] sm:$0xff] }
   0x9   :  { %91 = vmatpush1.msra.mxu0 %v23_v15  ;;  %162 = vmatpush1.msra.mxu1 %v25_v16  ;;  %v39_v22 = vld [vmem:[%s345_s2] sm:$0xff] }
   0xa   :  { %92 = vmatprep.subr.mxu0 %v20_v17  ;;  %163 = vmatprep.subr.mxu1 %v22_v18 }
   0xb   :  { %93 = vmatpush1.msra.mxu0 %v19_v19  ;;  %164 = vmatpush1.msra.mxu1 %v21_v20 }
   0xc   :  { %228 = vmatmul.mubr.msk.f32.vlgmr.msra.gmra.mxu0 %vm45_vm1, %v18_v21  ;;  %231 = vmatmul.mubr.msk.f32.vlgmr.msra.gmra.mxu1 %vm45_vm1, %v18_v21 }
   0xd   :  { %234 = vset.pattern.permute.xlu0 %v236_v23 }
   0xe   :  { %42 = vperm.xlu0 %234, %v39_v22  }
  0x89   :  { %v43_v24 = vpop.permute.xlu0 %42 }
  0xcc   :  { %v128_v25 = vpop.f32.mrf.mxu0  ;;  %v199_v27 = vpop.f32.mrf.mxu1 }
  0xcd   :  { %v129_v28 = vadd.f32 %v128_v25, %v43_v24  ;;  %v200_v29 = vadd.f32 %v199_v27, %v43_v24 }
  0xce   :  { %v130_v30 = vpop.f32.mrf.mxu0  ;;  %v201_v31 = vpop.f32.mrf.mxu1 }
  0xcf   :  { %vm205_vm2 = vcmp.ge.f32.partialorder %v129_v28, 0.0  ;;  %v210_v32 = vmul.f32 %v209_v26, %v129_v28  ;;  %vm207_vm3 = vcmp.ge.f32.partialorder %v200_v29, 0.0  ;;  %v212_v33 = vmul.f32 %v209_v26, %v200_v29 }
  0xd0   :  { %v131_v34 = vadd.f32 %v130_v30, %v43_v24  ;;  %v202_v35 = vadd.f32 %v201_v31, %v43_v24 }
  0xd1   :  { %v214_v36 = vsel %vm205_vm2, %v129_v28, %v210_v32  ;;  %v216_v37 = vsel %vm207_vm3, %v200_v29, %v212_v33 }
  0xd2   :  { %218 = vst [vmem:[%s347_s4] sm:$0xff] %v214_v36  ;;  %220 = vst [vmem:[%s347_s4 + $0x10] sm:$0xff] %v216_v37  ;;  %vm206_vm4 = vcmp.ge.f32.partialorder %v131_v34, 0.0  ;;  %v211_v38 = vmul.f32 %v209_v26, %v131_v34  ;;  %vm208_vm5 = vcmp.ge.f32.partialorder %v202_v35, 0.0  ;;  %v213_v39 = vmul.f32 %v209_v26, %v202_v35 }
  0xd4   :  { %v215_v40 = vsel %vm206_vm4, %v131_v34, %v211_v38  ;;  %v217_v41 = vsel %vm208_vm5, %v202_v35, %v213_v39 }
  0xd5   :  { %219 = vst [vmem:[%s347_s4 + $0x8] sm:$0xff] %v215_v40  ;;  %221 = vst [vmem:[%s347_s4 + $0x18] sm:$0xff] %v217_v41 }

</bundles_post_ra>
